<compile_context>
chip_gen: v7x
topology: tpu7x:2x2x1
jax: 0.10.0
libtpu: 0.0.40
codegen_flags: <defaults>
</compile_context>

<pallas_src>
import math
import functools

import jax
import jax.numpy as jnp
from jax.experimental import pallas as pl
from jax.experimental.pallas import tpu as pltpu

_MIB = 1024 * 1024


def _round_up(x, m):
    return ((x + m - 1) // m) * m


@functools.lru_cache(maxsize=1)
def _tpu_config():
    """Best-effort (generation, vmem_capacity_bytes) with safe fallbacks."""
    gen = 6
    try:
        kind = jax.devices()[0].device_kind.lower()
        for g in (7, 6, 5, 4):
            if f"v{g}" in kind:
                gen = g
                break
    except Exception:
        pass
    try:
        vmem_cap = int(pltpu.get_tpu_info().vmem_capacity_bytes)
    except Exception:
        vmem_cap = 64 * _MIB if gen >= 7 else 128 * _MIB
    return gen, vmem_cap


def _tile_limits(gen, vmem_cap):
    """(tm_max, tn_max, tk_max, vmem_budget_bytes) per chip generation."""
    if gen >= 7:
        # 64 MiB VMEM / TC: keep double-buffered tiles ~<12 MiB, limit <= 44 MiB.
        return 512, 512, 1024, min(44 * _MIB, max(32 * _MIB, vmem_cap - 16 * _MIB))
    # v5e / v6e: 128 MiB VMEM -> larger K tiles for more weight reuse per HBM read.
    return 512, 512, 2048, min(96 * _MIB, max(32 * _MIB, vmem_cap - 24 * _MIB))


def _vmem_footprint(tm, tn, tk, in_itemsize, out_itemsize, use_bias):
    b = 2 * (tm * tk + tk * tn) * in_itemsize     # double-buffered inputs
    if use_bias:
        b += 2 * tn * out_itemsize                # double-buffered bias row
    b += 2 * tm * tn * out_itemsize               # double-buffered output
    b += tm * tn * 4                              # f32 accumulator scratch
    return b


# ----------------------------- kernels --------------------------------------
def _mm_core(x_ref, w_ref, acc_ref, o_ref, b_ref, precision):
    k = pl.program_id(2)
    prod = jnp.dot(x_ref[...], w_ref[...],
                   preferred_element_type=jnp.float32, precision=precision)

    @pl.when(k == 0)
    def _():
        acc_ref[...] = prod          # first K step writes (no zero-fill store)

    @pl.when(k > 0)
    def _():
        acc_ref[...] += prod

    @pl.when(k == pl.num_programs(2) - 1)
    def _():
        out = acc_ref[...]
        if b_ref is not None:
            out = out + b_ref[...].astype(jnp.float32)   # bias only in epilogue
        o_ref[...] = out.astype(o_ref.dtype)


def _grid_kernel_bias(x_ref, w_ref, b_ref, o_ref, acc_ref, *, precision):
    _mm_core(x_ref, w_ref, acc_ref, o_ref, b_ref, precision)


def _grid_kernel_nobias(x_ref, w_ref, o_ref, acc_ref, *, precision):
    _mm_core(x_ref, w_ref, acc_ref, o_ref, None, precision)


def _single_kernel_bias(x_ref, w_ref, b_ref, o_ref, *, precision):
    acc = jnp.dot(x_ref[...], w_ref[...],
                  preferred_element_type=jnp.float32, precision=precision)
    o_ref[...] = (acc + b_ref[...].astype(jnp.float32)).astype(o_ref.dtype)


def _single_kernel_nobias(x_ref, w_ref, o_ref, *, precision):
    o_ref[...] = jnp.dot(x_ref[...], w_ref[...],
                         preferred_element_type=jnp.float32,
                         precision=precision).astype(o_ref.dtype)


# ----------------------------- wrapper ---------------------------------------
def prepare_linear_weight(weight):
    """Hoisted weight prep: transpose the PyTorch-layout (out, in) weight to (K, N)
    ONCE (at param init / load time) so the per-call hot path never re-streams it."""
    return jnp.asarray(weight).T


@functools.partial(
    jax.jit, static_argnames=("use_bias", "weight_is_transposed", "compute_dtype"))
def pallas_linear(x, weight, bias=None, *, use_bias=True,
                  weight_is_transposed=False, compute_dtype=None):
    """y = x @ W^T (+ b) for x of shape (..., in_features).

    weight: (out_features, in_features) or, if weight_is_transposed=True, the
    pre-transposed (in_features, out_features) array from prepare_linear_weight().
    """
    if weight_is_transposed:
        in_features, out_features = weight.shape
    else:
        out_features, in_features = weight.shape
    assert x.shape[-1] == in_features

    lead_shape = x.shape[:-1]
    m = int(math.prod(lead_shape)) if lead_shape else 1
    out_dtype = x.dtype

    # ---- degenerate shapes ---------------------------------------------------
    if m == 0 or out_features == 0:
        return jnp.zeros((*lead_shape, out_features), dtype=out_dtype)
    if in_features == 0:
        y = jnp.zeros((m, out_features), dtype=jnp.float32)
        if use_bias:
            y = y + bias.astype(jnp.float32)
        return y.astype(out_dtype).reshape(*lead_shape, out_features)

    x2d = x.reshape(m, in_features)
    # Weight fed to the MXU as (K, N). Prefer the hoisted, pre-transposed weight;
    # the fallback below transposes per call (extra HBM pass) for API compatibility.
    w_kn = weight if weight_is_transposed else weight.T

    if compute_dtype is not None:                      # optional bf16 fast path
        x2d = x2d.astype(compute_dtype)
        w_kn = w_kn.astype(compute_dtype)
    elif x2d.dtype != w_kn.dtype:
        cd = jnp.promote_types(x2d.dtype, w_kn.dtype)
        x2d = x2d.astype(cd)
        w_kn = w_kn.astype(cd)

    op_dtype = x2d.dtype
    itemsize = jnp.dtype(op_dtype).itemsize
    out_itemsize = jnp.dtype(out_dtype).itemsize
    # f32 operands: force full-precision MXU passes (parity with fp32 F.linear).
    precision = (jax.lax.Precision.HIGHEST if op_dtype == jnp.float32
                 else jax.lax.Precision.DEFAULT)

    K, N = in_features, out_features
    gen, vmem_cap = _tpu_config()
    tm_max, tn_max, tk_max, vmem_budget = _tile_limits(gen, vmem_cap)

    bias2d = bias.reshape(1, N) if use_bias else None

    # ---- tiny-layer fast path: one block, no grid / padding / scratch -------
    if m <= 256 and K <= 1024 and N <= 512:
        if use_bias:
            kernel = functools.partial(_single_kernel_bias, precision=precision)
            args = (x2d, w_kn, bias2d)
        else:
            kernel = functools.partial(_single_kernel_nobias, precision=precision)
            args = (x2d, w_kn)
        y2d = pl.pallas_call(
            kernel, out_shape=jax.ShapeDtypeStruct((m, N), out_dtype))(*args)
        return y2d.reshape(*lead_shape, out_features)

    # ---- tiled (M, N, K) grid path ------------------------------------------
    sub = max(8, 32 // itemsize)                 # sublane multiple for op dtype
    tm = min(tm_max, _round_up(m, sub))
    tn = min(tn_max, _round_up(N, 128))
    tk = min(tk_max, _round_up(K, 128))

    m_pad = _round_up(m, tm)
    n_pad = _round_up(N, tn)
    k_pad = _round_up(K, tk)

    # v7x has 2 TensorCores sharded over the "parallel" axes: make sure there are
    # at least 2 parallel (i, j) blocks so neither core idles on small-batch linears.
    if gen >= 7 and (m_pad // tm) * (n_pad // tn) < 2 and n_pad >= 256 and n_pad % 256 == 0:
        tn = n_pad // 2

    # Zero-pad (zero-width pads fold away when shapes are already tile-aligned).
    x_p = x2d if (m_pad == m and k_pad == K) else \
        jnp.pad(x2d, ((0, m_pad - m), (0, k_pad - K)))
    w_p = w_kn if (k_pad == K and n_pad == N) else \
        jnp.pad(w_kn, ((0, k_pad - K), (0, n_pad - N)))

    grid = (m_pad // tm, n_pad // tn, k_pad // tk)

    footprint = _vmem_footprint(tm, tn, tk, itemsize, out_itemsize, use_bias)
    vmem_limit = int(max(32 * _MIB, min(vmem_budget, footprint + 16 * _MIB)))

    cost = pl.CostEstimate(
        flops=2 * m_pad * n_pad * k_pad,
        transcendentals=0,
        bytes_accessed=(m_pad * k_pad + k_pad * n_pad) * itemsize
                       + (m_pad * n_pad + n_pad) * out_itemsize,
    )
    cparams = pltpu.CompilerParams(
        dimension_semantics=("parallel", "parallel", "arbitrary"),
        vmem_limit_bytes=vmem_limit,
    )

    x_spec = pl.BlockSpec((tm, tk), lambda i, j, k: (i, k))
    # TODO(synk): if still DMA-bound for skinny-M / huge-K*N shapes, deepen the
    # weight pipeline with pipeline_mode=pl.Buffered(3) on w_spec.
    w_spec = pl.BlockSpec((tk, tn), lambda i, j, k: (k, j))
    o_spec = pl.BlockSpec((tm, tn), lambda i, j, k: (i, j))
    scratch = [pltpu.VMEM((tm, tn), jnp.float32)]

    if use_bias:
        b_p = bias2d if n_pad == N else jnp.pad(bias2d, ((0, 0), (0, n_pad - N)))
        kernel = functools.partial(_grid_kernel_bias, precision=precision)
        in_specs = [x_spec, w_spec, pl.BlockSpec((1, tn), lambda i, j, k: (0, j))]
        args = (x_p, w_p, b_p)
    else:
        kernel = functools.partial(_grid_kernel_nobias, precision=precision)
        in_specs = [x_spec, w_spec]
        args = (x_p, w_p)

    y_p = pl.pallas_call(
        kernel,
        out_shape=jax.ShapeDtypeStruct((m_pad, n_pad), out_dtype),
        grid_spec=pltpu.PrefetchScalarGridSpec(
            num_scalar_prefetch=0,
            grid=grid,
            in_specs=in_specs,
            out_specs=o_spec,
            scratch_shapes=scratch,
        ),
        compiler_params=cparams,
        cost_estimate=cost,
    )(*args)

    y2d = y_p if (m_pad == m and n_pad == N) else y_p[:m, :N]
    return y2d.reshape(*lead_shape, out_features)


def init_linear_params(key, in_features, out_features, dtype=jnp.float32):
    """Mimics nn.Linear reset_parameters():
       kaiming_uniform_(weight, a=sqrt(5))  => U(-sqrt(1/fan_in), sqrt(1/fan_in))
       bias ~ U(-1/sqrt(fan_in), 1/sqrt(fan_in))
    """
    kw, kb = jax.random.split(key)
    bound = 1.0 / math.sqrt(in_features)
    weight = jax.random.uniform(
        kw, (out_features, in_features), dtype=dtype, minval=-bound, maxval=bound)
    bias = jax.random.uniform(
        kb, (out_features,), dtype=dtype, minval=-bound, maxval=bound)
    return weight, bias


if __name__ == "__main__":
    key = jax.random.PRNGKey(0)
    k_x, k_p, k_x2, k_p2 = jax.random.split(key, 4)

    # ---- small demo (single-block fast path) ---------------------------------
    in_features, out_features = 32, 16
    x = jax.random.normal(k_x, (2, 8, in_features), dtype=jnp.float32)
    weight, bias = init_linear_params(k_p, in_features, out_features)
    w_t = prepare_linear_weight(weight)          # hoisted (K, N) weight, built once

    y = pallas_linear(x, w_t, bias, use_bias=True, weight_is_transposed=True)
    y = jax.block_until_ready(y)
    y_ref = jnp.matmul(x, weight.T, precision=jax.lax.Precision.HIGHEST) + bias
    assert y.shape == (2, 8, out_features)
    assert jnp.allclose(y, y_ref, atol=1e-5, rtol=1e-5)

    y_nb = pallas_linear(x, weight, None, use_bias=False)    # untransposed fallback
    y_nb = jax.block_until_ready(y_nb)
    y_nb_ref = jnp.matmul(x, weight.T, precision=jax.lax.Precision.HIGHEST)
    assert jnp.allclose(y_nb, y_nb_ref, atol=1e-5, rtol=1e-5)

    # ---- modest shape exercising the tiled grid path -------------------------
    in2, out2 = 384, 256
    x2 = jax.random.normal(k_x2, (2, 160, in2), dtype=jnp.float32)    # m = 320
    w2, b2 = init_linear_params(k_p2, in2, out2)
    w2_t = prepare_linear_weight(w2)
    y2 = pallas_linear(x2, w2_t, b2, use_bias=True, weight_is_transposed=True)
    y2 = jax.block_until_ready(y2)
    y2_ref = jnp.matmul(x2, w2.T, precision=jax.lax.Precision.HIGHEST) + b2
    assert y2.shape == (2, 160, out2)
    assert jnp.allclose(y2, y2_ref, atol=1e-4, rtol=1e-4)

    # TODO(synk): spike_in=True path (snngrow_F.linear over SpikeTensor) has no
    # plain-tensor semantics here; only the dense F.linear path is implemented.
    print("KERNEL_OK")
</pallas_src>

<mosaic_0001>
module attributes {stable_mosaic.version = 11 : i64} {
  func.func @_single_kernel_bias(%arg0: memref<16x32xf32, #tpu.memory_space<vmem>>, %arg1: memref<32x16xf32, #tpu.memory_space<vmem>>, %arg2: memref<1x16xf32, #tpu.memory_space<vmem>>, %arg3: memref<16x16xf32, #tpu.memory_space<vmem>>) attributes {dimension_semantics = [], scalar_prefetch = 0 : i64, scratch_operands = 0 : i64, tpu.core_type = #tpu.core_type<tc>} {
    %c0 = arith.constant 0 : index
    %c0_0 = arith.constant 0 : index
    %0 = vector.load %arg0[%c0, %c0_0] : memref<16x32xf32, #tpu.memory_space<vmem>>, vector<16x32xf32>
    %c0_1 = arith.constant 0 : index
    %c0_2 = arith.constant 0 : index
    %1 = vector.load %arg1[%c0_1, %c0_2] : memref<32x16xf32, #tpu.memory_space<vmem>>, vector<32x16xf32>
    %cst = arith.constant dense<0.000000e+00> : vector<16x16xf32>
    %2 = tpu.matmul %0, %1, %cst {dimension_numbers = #tpu.dot_dimension_numbers<[1], [0], [0], [1], [0, 0, 1, 1], [], []>, precision = #tpu.contract_precision<fp32>} : vector<16x32xf32>, vector<32x16xf32>, vector<16x16xf32> -> vector<16x16xf32>
    %c0_3 = arith.constant 0 : index
    %c0_4 = arith.constant 0 : index
    %3 = vector.load %arg2[%c0_3, %c0_4] : memref<1x16xf32, #tpu.memory_space<vmem>>, vector<1x16xf32>
    %4 = vector.broadcast %3 : vector<1x16xf32> to vector<16x16xf32>
    %5 = arith.addf %2, %4 : vector<16x16xf32>
    %c0_5 = arith.constant 0 : index
    %c0_6 = arith.constant 0 : index
    %6 = vector.load %arg3[%c0_5, %c0_6] : memref<16x16xf32, #tpu.memory_space<vmem>>, vector<16x16xf32>
    tpu.vector_store %arg3[%c0_5, %c0_6], %5 {strides = array<i32>} : memref<16x16xf32, #tpu.memory_space<vmem>>, vector<16x16xf32>,
    return
  }
}

</mosaic_0001>

<bundles_post_ra>
// kernel: pallas_linear.1
= control target key start
LH: loop header
LB: loop body
LE: loop exit
PB: predicated region body
PF: predicated region fallthrough
CT: control target
= control target key end

     0   :  { %vm28_vm0 = vcmask 261120   ;;  %s840_s0 = inlined_call_operand.vmem [shape: f32[16,32], index: 0, kind: input, shape index: {}]   ;;  %s841_s1 = inlined_call_operand.vmem [shape: f32[32,16], index: 1, kind: input, shape index: {}]   ;;  %s842_s2 = inlined_call_operand.vmem [shape: f32[1,16], index: 2, kind: input, shape index: {}]   ;;  %s843_s3 = inlined_call_operand.hbm [shape: f32[16,16], index: 3, kind: output, shape index: {}]  }
   0x1   :  { %v17_v0 = vld [vmem:[%s841_s1] sm:$0xff]  ;;  %v18_v1 = vld [vmem:[%s841_s1 + $0x8] sm:$0xff]  ;;  %v19_v2 = vld [vmem:[%s841_s1 + $0x10] sm:$0xff] }
   0x2   :  { %v36_v3 = vand.u32 4294901760, %v17_v0  ;;  %v39_v4 = vand.u32 4294901760, %v18_v1  ;;  %v20_v5 = vld [vmem:[%s841_s1 + $0x18] sm:$0xff]  ;;  %v42_v6 = vand.u32 4294901760, %v19_v2  ;;  %v15_v7 = vld [vmem:[%s840_s0] sm:$0xff]  ;;  %v16_v8 = vld [vmem:[%s840_s0 + $0x8] sm:$0xff] }
   0x3   :  { %v45_v9 = vand.u32 4294901760, %v20_v5  ;;  %v30_v10 = vsel %vm28_vm0, %v15_v7, 0  ;;  %v33_v11 = vsel %vm28_vm0, %v16_v8, 0 }
   0x4   :  { %v685_v12 = vpack.c.bf16 %v39_v4, %v36_v3  ;;  %v813_v13 = vand.u32 4294901760, %v30_v10  ;;  %v815_v14 = vand.u32 4294901760, %v33_v11  ;;  %v126_v15 = vsub.f32 %v17_v0, %v36_v3 }
   0x5   :  { %8 = vsyncpa [#allocation3], 0  ;;  %v689_v16 = vpack.c.bf16 %v45_v9, %v42_v6  ;;  %v133_v17 = vsub.f32 %v18_v1, %v39_v4  ;;  %v140_v18 = vsub.f32 %v19_v2, %v42_v6  ;;  %v147_v19 = vsub.f32 %v20_v5, %v45_v9  ;;  %v582_v46 = vld [vmem:[%s842_s2] ss:$0 sm:$0xff]  ;;  %s772_s24 = smov [#allocation2]  }
   0x6   :  { %686 = vmatprep.subr.bf16.mxu1 %v685_v12  ;;  %710 = vmatprep.subr.bf16.mxu0 %v685_v12  ;;  %v105_v20 = vsub.f32 %v30_v10, %v813_v13  ;;  %v115_v21 = vsub.f32 %v33_v11, %v815_v14  ;;  %v127_v22 = vand.u32 4294901760, %v126_v15  ;;  %s571_s25 = sshll.u32 %s772_s24, 4  ;;  %vm563_vm1 = vcmask 130048   ;;  %s572_s25 = int_to_ptr.vmem [resolvable:$true] %s571_s25 }
   0x7   :  { %688 = vmatpush3.bf16.msra.mxu1 %v685_v12  ;;  %712 = vmatpush3.bf16.msra.mxu0 %v685_v12  ;;  %v134_v23 = vand.u32 4294901760, %v133_v17  ;;  %v141_v24 = vand.u32 4294901760, %v140_v18  ;;  %v148_v25 = vand.u32 4294901760, %v147_v19  ;;  %v701_v44 = vpack.c.bf16 %v133_v17, %v126_v15  ;;  %s748_s26 = scalar_lea.vmem %s572_s25, 256  ;;  %p753_p1 = scmp.lt.s32.totalorder %s572_s25, %s572_s25 }
   0x8   :  { %690 = vmatprep.subr.bf16.mxu1 %v689_v16  ;;  %714 = vmatprep.subr.bf16.mxu0 %v689_v16  ;;  %v106_v26 = vand.u32 4294901760, %v105_v20  ;;  %v116_v27 = vand.u32 4294901760, %v115_v21  ;;  %v128_v28 = vsub.f32 %v126_v15, %v127_v22  ;;  %v705_v45 = vpack.c.bf16 %v147_v19, %v140_v18  ;;  %p749_p0 = scmp.ne.s32.totalorder %s572_s25, %s748_s26  ;;  %p754_p2 = scmp.lt.s32.totalorder %s748_s26, %s748_s26 }
   0x9   :  { %v135_v29 = vsub.f32 %v133_v17, %v134_v23  ;;  %v717_v30 = vpack.c.bf16 %v134_v23, %v127_v22  ;;  %v142_v31 = vsub.f32 %v140_v18, %v141_v24  ;;  %v149_v32 = vsub.f32 %v147_v19, %v148_v25 }
   0xa   :  { %v107_v33 = vsub.f32 %v105_v20, %v106_v26  ;;  %660 = vmatprep.mubr.f32.mxu0 %v106_v26  ;;  %v117_v34 = vsub.f32 %v115_v21, %v116_v27  ;;  %v129_v35 = vand.u32 4294901760, %v128_v28  ;;  %v721_v43 = vpack.c.bf16 %v148_v25, %v141_v24  ;;  %p755_p3 = por %p754_p2, %p753_p1 }
   0xb   :  { %692 = vmatpush3.bf16.msra.mxu1 %v689_v16  ;;  %716 = vmatpush3.bf16.msra.mxu0 %v689_v16  ;;  %v136_v36 = vand.u32 4294901760, %v135_v29  ;;  %v143_v37 = vand.u32 4294901760, %v142_v31  ;;  %v150_v38 = vand.u32 4294901760, %v149_v32 }
   0xc   :  { %v108_v39 = vand.u32 4294901760, %v107_v33  ;;  %v118_v40 = vand.u32 4294901760, %v117_v34  ;;  %718 = vmatprep.subr.bf16.mxu0 %v717_v30  ;;  %p756_p4 = pnand %p755_p3, %p749_p0 }
   0xd   :  { %v693_v41 = vpack.c.bf16 %v136_v36, %v129_v35  ;;  %v697_v42 = vpack.c.bf16 %v150_v38, %v143_v37 }
   0xe   :  { %627 = vmatprep.mubr.f32.mxu1 %v108_v39  ;;  %661 = vmatmul.mubr.f32.vlgmr.msra.gmra.mrb[0].mxu0 %v116_v27 }
   0xf   :  { %628 = vmatmul.mubr.f32.vlgmr.msra.gmra.mrb[0].mxu1 %v118_v40  ;;  %694 = vmatprep.subr.bf16.mxu1 %v693_v41 }
  0x10   :  { %696 = vmatpush3.bf16.msra.mxu1 %v693_v41  ;;  %720 = vmatpush3.bf16.msra.mxu0 %v717_v30 }
  0x11   :  { %698 = vmatprep.subr.bf16.mxu1 %v697_v42  ;;  %722 = vmatprep.subr.bf16.mxu0 %v721_v43 }
  0x12   :  { %638 = vmatprep.mubr.f32.mxu1 %v813_v13  ;;  %671 = vmatprep.mubr.f32.mxu0 %v813_v13 }
  0x14   :  { %700 = vmatpush3.bf16.msra.mxu1 %v697_v42  ;;  %724 = vmatpush3.bf16.msra.mxu0 %v721_v43 }
  0x15   :  { %702 = vmatprep.subr.bf16.mxu1 %v701_v44  ;;  %726 = vmatprep.subr.bf16.mxu0 %v685_v12 }
  0x17   :  { %639 = vmatmul.mubr.f32.vlgmr.msra.gmra.mrb[0].mxu1 %v815_v14  ;;  %672 = vmatmul.mubr.f32.vlgmr.msra.gmra.mrb[0].mxu0 %v815_v14 }
  0x18   :  { %704 = vmatpush3.bf16.msra.mxu1 %v701_v44  ;;  %728 = vmatpush3.bf16.msra.mxu0 %v685_v12 }
  0x19   :  { %706 = vmatprep.subr.bf16.mxu1 %v705_v45  ;;  %730 = vmatprep.subr.bf16.mxu0 %v689_v16 }
  0x1a   :  { %649 = vmatprep.mubr.f32.mxu1 %v105_v20  ;;  %682 = vmatprep.mubr.f32.mxu0 %v813_v13 }
  0x1c   :  { %708 = vmatpush3.bf16.msra.mxu1 %v705_v45  ;;  %732 = vmatpush3.bf16.msra.mxu0 %v689_v16 }
  0x1f   :  { %650 = vmatmul.mubr.f32.vlgmr.msra.gmra.mrb[0].mxu1 %v115_v21  ;;  %683 = vmatmul.mubr.f32.vlgmr.msra.gmra.mrb[0].mxu0 %v815_v14 }
  0xf2   :  { %v651_v47 = vpop.f32.mrb[0].mxu1  ;;  %v684_v48 = vpop.f32.mrb[0].mxu0 }
  0xf3   :  { %v733_v49 = vadd.f32 %v651_v47, %v582_v46  ;;  %v297_v50 = vpop.f32.mrb[1].mxu1  ;;  %v553_v51 = vpop.f32.mrb[1].mxu0 }
  0xf4   :  { %v735_v52 = vadd.f32 %v582_v46, %v297_v50 }
  0xf5   :  { %v734_v53 = vadd.f32 %v733_v49, %v684_v48 }
  0xf6   :  { %v736_v54 = vadd.f32 %v735_v52, %v553_v51 }
  0xf7   :  { %565 = vst.msk [vmem:[#allocation2 + $0x8] sm:$0xff] %vm563_vm1, %v734_v53 }
  0xf8   :  { %564 = vst.msk [vmem:[#allocation2] sm:$0xff] %vm563_vm1, %v736_v54 }
  0xf9   :  { %759 = shalt.err (!%p756_p4)
}
  0xfa   :  { %s760_s28 = scalar_lea.hbm %s843_s3, 256 }
  0xfb   :  { %p761_p5 = scmp.ne.s32.totalorder %s843_s3, %s760_s28  ;;  %p764_p6 = scmp.lt.u32.totalorder %s760_s28, %s843_s3 }
  0xfd   :  { %p766_p7 = pnand %p764_p6, %p761_p5 }
  0xff   :  { %769 = shalt.err (!%p766_p7)
}
 0x100   :  { %s773_s6 = smov 128   ;;  %s774_s7 = smov 8  }
 0x101   :  { %577 = dma.vmem_to_hbm [thread:$0]  %s572_s25, 256, %s843_s3, [#allocation3], %s773_s6, %s773_s6, %s774_s7  }
 0x102   :  { %770 = dma.done.wait [#allocation3], 256  }
 0x103   :  { %771 = vsyncadd [#allocation3], 4294967040 }
 0x104   :  { %581 = vsyncpa [#allocation3], 1 }

</bundles_post_ra>
